<compile_context>
chip_gen: v5e
topology: v5e:2x2
jax: 0.10.0
libtpu: 0.0.40
codegen_flags: <defaults>
</compile_context>

<pallas_src>
import functools
import math

import jax
import jax.numpy as jnp
from jax import lax
from jax.experimental import pallas as pl
from jax.experimental.pallas import tpu as pltpu


def _pick_tile(n, *, align, target):
    """Largest multiple of `align` that divides n and is <= target; else n itself
    (the full extent is always a legal block size)."""
    if n <= target:
        return n
    hi = (target // align) * align
    for t in range(hi, 0, -align):
        if n % t == 0:
            return t
    return n


# ----------------------------------------------------------------------------
# Pass 1: fused projection  seq @ [W_fts^T | w_f1^T | w_f2^T]  (one MXU matmul)
# ----------------------------------------------------------------------------
def proj_kernel(seq_ref, w_ref, bf1_ref, bf2_ref, fts_ref, f1_ref, f2t_ref, *, dout):
    """seq_ref: (B, TM, Din) VMEM.  w_ref: (Din, Dout+2) VMEM, MXU-native (K, N) layout.
    bf1/bf2: (1,1) SMEM scalars.
    Outputs: fts (B, TM, Dout), f1 (B, TM, 1) sublane-major, f2t (B, 1, TM) lane-major."""
    B, TM, Din = seq_ref.shape

    seq2d = seq_ref[...].reshape(B * TM, Din)              # fatten MXU M dim
    proj = lax.dot_general(seq2d, w_ref[...],
                           (((1,), (0,)), ((), ())),       # canonical (M,K)x(K,N)
                           preferred_element_type=jnp.float32)   # (B*TM, Dout+2)
    proj = proj.reshape(B, TM, dout + 2)

    fts_ref[...] = proj[:, :, :dout].astype(fts_ref.dtype)

    f1 = proj[:, :, dout:dout + 1] + bf1_ref[0, 0]         # (B, TM, 1)
    f2 = proj[:, :, dout + 1:dout + 2] + bf2_ref[0, 0]     # (B, TM, 1)
    f1_ref[...] = f1.astype(f1_ref.dtype)
    # Emit f2 lane-major once here (one small sublane->lane relayout per tile) so the
    # attention pass never has to transpose.
    f2t_ref[...] = f2.reshape(B, 1, TM).astype(f2t_ref.dtype)


# ----------------------------------------------------------------------------
# Pass 2: per query-row tile: logits -> leaky_relu -> softmax(dim=0) -> @ seq_fts
# ----------------------------------------------------------------------------
def attn_kernel(fts_ref, f2t_ref, f1_ref, bias_ref, out_ref, *, negative_slope):
    """fts_ref: (B, N, Dout) resident.  f2t_ref: (B, 1, N) resident (lane-major).
    f1_ref: (B, TN, 1) query tile.  bias_ref: (1,1) SMEM scalar.  out_ref: (B, TN, Dout)."""
    f1 = f1_ref[...]                                       # (B, TN, 1)
    f2 = f2t_ref[...]                                      # (B, 1, N)

    logits = f1 + f2                                       # (B, TN, N)
    x = jnp.where(logits >= 0, logits, negative_slope * logits)   # leaky_relu

    # F.softmax with implicit dim on a 3-D tensor -> dim=0 (batch) in PyTorch.
    # Reduction over the leading axis is pure VPU work (no cross-lane shuffles).
    m = jnp.max(x, axis=0, keepdims=True)                  # (1, TN, N)
    e = jnp.exp(x - m)
    den = jnp.sum(e, axis=0, keepdims=True)                # (1, TN, N)

    # EUP approx reciprocal + 2 Newton-Raphson refinements (keeps 1e-5 f32 parity,
    # far cheaper than the exact divide path; drop to 1 step if ~1e-4 is acceptable).
    r = pl.reciprocal(den, approx=True)
    r = r * (2.0 - den * r)
    r = r * (2.0 - den * r)
    coefs = e * r                                          # (B, TN, N)

    vals = jnp.einsum("bij,bjd->bid", coefs, fts_ref[...],
                      preferred_element_type=jnp.float32)  # (B, TN, Dout)
    ret = vals + bias_ref[0, 0]
    # TODO(synk): residual=True branch (optional extra Linear / skip-add) not wired in;
    # the module default (residual=False) is implemented.
    out_ref[...] = jnp.maximum(ret, 0.0).astype(out_ref.dtype)   # default act_fn = relu


# ----------------------------------------------------------------------------
# Wrapper
# ----------------------------------------------------------------------------
@functools.partial(jax.jit, static_argnames=("negative_slope",))
def attn_head(seq, params, *, negative_slope=0.01):
    """params in PyTorch layouts:
       w_fts (Dout, Din)  [no bias],  w_f1 (1, Din), b_f1 (1,),  w_f2 (1, Din), b_f2 (1,),
       bias (1,)  [learned scalar]."""
    B, N, Din = seq.shape
    Dout = params["w_fts"].shape[0]

    # One-time parameter fusion outside the kernels: fused weight in MXU-native (K, N)
    # layout; columns [0:Dout] = W_fts^T, column Dout = w_f1^T, column Dout+1 = w_f2^T.
    w_all = jnp.concatenate(
        [params["w_fts"], params["w_f1"], params["w_f2"]], axis=0).T.astype(jnp.float32)

    bf1 = params["b_f1"].reshape(1, 1).astype(jnp.float32)
    bf2 = params["b_f2"].reshape(1, 1).astype(jnp.float32)
    bias = params["bias"].reshape(1, 1).astype(jnp.float32)

    cparams = pltpu.CompilerParams(
        dimension_semantics=("parallel",),            # megacore sharding on v7x
        vmem_limit_bytes=32 * 1024 * 1024)            # safe scoped budget on v5e/v6e/v7x

    smem_scalar = lambda: pl.BlockSpec((1, 1), lambda i: (0, 0),
                                       memory_space=pltpu.MemorySpace.SMEM)

    # ---------------- pass 1: fused projection ----------------
    # TM must be a multiple of 128 (or the full N) because of the lane-major f2t block.
    TM = _pick_tile(N, align=128, target=512)
    fts, f1, f2t = pl.pallas_call(
        functools.partial(proj_kernel, dout=Dout),
        grid=(N // TM,),
        in_specs=[
            pl.BlockSpec((B, TM, Din), lambda i: (0, i, 0)),        # seq row tile
            pl.BlockSpec((Din, Dout + 2), lambda i: (0, 0)),        # fused weight (resident)
            smem_scalar(),                                          # b_f1
            smem_scalar(),                                          # b_f2
        ],
        out_specs=[
            pl.BlockSpec((B, TM, Dout), lambda i: (0, i, 0)),       # seq_fts
            pl.BlockSpec((B, TM, 1), lambda i: (0, i, 0)),          # f1 (sublane-major)
            pl.BlockSpec((B, 1, TM), lambda i: (0, 0, i)),          # f2 (lane-major)
        ],
        out_shape=[
            jax.ShapeDtypeStruct((B, N, Dout), jnp.float32),
            jax.ShapeDtypeStruct((B, N, 1), jnp.float32),
            jax.ShapeDtypeStruct((B, 1, N), jnp.float32),
        ],
        compiler_params=cparams,
    )(seq.astype(jnp.float32), w_all, bf1, bf2)

    # ---------------- pass 2: tiled attention ----------------
    TN = _pick_tile(N, align=8, target=128)
    out = pl.pallas_call(
        functools.partial(attn_kernel, negative_slope=negative_slope),
        grid=(N // TN,),
        in_specs=[
            pl.BlockSpec((B, N, Dout), lambda i: (0, 0, 0)),        # seq_fts (resident)
            pl.BlockSpec((B, 1, N), lambda i: (0, 0, 0)),           # f2 lane-major (resident)
            pl.BlockSpec((B, TN, 1), lambda i: (0, i, 0)),          # f1 query tile
            smem_scalar(),                                          # scalar bias
        ],
        # NOTE: Dout=32 < 128 lanes -> masked stores; at production pad Dout to a
        # multiple of 128 (or present a lane-dense slab) for unmasked vst.
        out_specs=pl.BlockSpec((B, TN, Dout), lambda i: (0, i, 0)),
        out_shape=jax.ShapeDtypeStruct((B, N, Dout), seq.dtype),
        compiler_params=cparams,
    )(fts, f2t, f1, bias)
    return out


def attn_head_reference(seq, params, *, negative_slope=0.01):
    """Plain-JAX reference mirroring the PyTorch forward (residual=False, act=relu)."""
    seq_fts = seq @ params["w_fts"].T
    f1 = seq @ params["w_f1"].T + params["b_f1"]           # (B, N, 1)
    f2 = seq @ params["w_f2"].T + params["b_f2"]           # (B, N, 1)
    logits = f1 + jnp.transpose(f2, (0, 2, 1))             # (B, N, N)
    x = jnp.where(logits >= 0, logits, negative_slope * logits)
    coefs = jax.nn.softmax(x, axis=0)                      # implicit-dim rule: dim=0 for 3-D
    vals = jnp.einsum("bij,bjd->bid", coefs, seq_fts)
    ret = vals + params["bias"]
    return jnp.maximum(ret, 0.0)


if __name__ == "__main__":
    # input_size == out_size (= 32) so that linear_layer_f_1/f_2 (declared with
    # in_features=out_size) are shape-consistent when applied to `seq`, as in the spec.
    B, N, D = 2, 8, 32

    key = jax.random.PRNGKey(0)
    ks = jax.random.split(key, 6)
    seq = jax.random.normal(ks[0], (B, N, D), dtype=jnp.float32)

    s = 1.0 / math.sqrt(D)
    params = {
        "w_fts": jax.random.uniform(ks[1], (D, D), jnp.float32, -s, s),  # (out, in), no bias
        "w_f1":  jax.random.uniform(ks[2], (1, D), jnp.float32, -s, s),
        "b_f1":  jax.random.uniform(ks[3], (1,),   jnp.float32, -s, s),
        "w_f2":  jax.random.uniform(ks[4], (1, D), jnp.float32, -s, s),
        "b_f2":  jax.random.uniform(ks[5], (1,),   jnp.float32, -s, s),
        "bias":  jnp.zeros((1,), jnp.float32),             # weight_init: zeros_
    }

    out = jax.block_until_ready(attn_head(seq, params))
    ref = jax.block_until_ready(attn_head_reference(seq, params))

    assert out.shape == (B, N, D)
    assert jnp.allclose(out, ref, atol=1e-5, rtol=1e-5), "mismatch vs reference"

    print("KERNEL_OK")
</pallas_src>

<mosaic_0001>
module attributes {stable_mosaic.version = 11 : i64} {
  func.func @proj_kernel(%arg0: i32, %arg1: memref<2x8x32xf32, #tpu.memory_space<vmem>>, %arg2: memref<32x34xf32, #tpu.memory_space<vmem>>, %arg3: memref<1x1xf32, #tpu.memory_space<smem>>, %arg4: memref<1x1xf32, #tpu.memory_space<smem>>, %arg5: memref<2x8x32xf32, #tpu.memory_space<vmem>>, %arg6: memref<2x8x1xf32, #tpu.memory_space<vmem>>, %arg7: memref<2x1x8xf32, #tpu.memory_space<vmem>>) attributes {dimension_semantics = [#tpu.dimension_semantics<parallel>], iteration_bounds = array<i64: 1>, scalar_prefetch = 0 : i64, scratch_operands = 0 : i64, tpu.core_type = #tpu.core_type<tc>, window_params = [{transform_indices = @transform_0, window_bounds = array<i64: 2, 8, 32>}, {pipeline_mode = #tpu.pipeline_mode<synchronous>, transform_indices = @transform_1, window_bounds = array<i64: 32, 34>}, {transform_indices = @transform_2, window_bounds = array<i64: 1, 1>}, {transform_indices = @transform_3, window_bounds = array<i64: 1, 1>}, {transform_indices = @transform_4, window_bounds = array<i64: 2, 8, 32>}, {transform_indices = @transform_5, window_bounds = array<i64: 2, 8, 1>}, {transform_indices = @transform_6, window_bounds = array<i64: 2, 1, 8>}]} {
    %c0 = arith.constant 0 : index
    %c0_0 = arith.constant 0 : index
    %c0_1 = arith.constant 0 : index
    %0 = vector.load %arg1[%c0, %c0_0, %c0_1] : memref<2x8x32xf32, #tpu.memory_space<vmem>>, vector<2x8x32xf32>
    %1 = vector.shape_cast %0 : vector<2x8x32xf32> to vector<16x32xf32>
    %c0_2 = arith.constant 0 : index
    %c0_3 = arith.constant 0 : index
    %2 = vector.load %arg2[%c0_2, %c0_3] : memref<32x34xf32, #tpu.memory_space<vmem>>, vector<32x34xf32>
    %cst = arith.constant dense<0.000000e+00> : vector<16x34xf32>
    %3 = tpu.matmul %1, %2, %cst {dimension_numbers = #tpu.dot_dimension_numbers<[1], [0], [0], [1], [0, 0, 1, 1], [], []>} : vector<16x32xf32>, vector<32x34xf32>, vector<16x34xf32> -> vector<16x34xf32>
    %4 = vector.shape_cast %3 : vector<16x34xf32> to vector<2x8x34xf32>
    %5 = vector.extract_strided_slice %4 {offsets = [0, 0, 0], sizes = [2, 8, 32], strides = [1, 1, 1]} : vector<2x8x34xf32> to vector<2x8x32xf32>
    %c0_4 = arith.constant 0 : index
    %c0_5 = arith.constant 0 : index
    %c0_6 = arith.constant 0 : index
    %6 = vector.load %arg5[%c0_4, %c0_5, %c0_6] : memref<2x8x32xf32, #tpu.memory_space<vmem>>, vector<2x8x32xf32>
    tpu.vector_store %arg5[%c0_4, %c0_5, %c0_6], %5 {strides = array<i32>} : memref<2x8x32xf32, #tpu.memory_space<vmem>>, vector<2x8x32xf32>,
    %7 = vector.extract_strided_slice %4 {offsets = [0, 0, 32], sizes = [2, 8, 1], strides = [1, 1, 1]} : vector<2x8x34xf32> to vector<2x8x1xf32>
    %c0_7 = arith.constant 0 : index
    %c0_8 = arith.constant 0 : index
    %8 = memref.load %arg3[%c0_7, %c0_8] : memref<1x1xf32, #tpu.memory_space<smem>>
    %9 = vector.broadcast %8 : f32 to vector<2x8x1xf32>
    %10 = arith.addf %7, %9 : vector<2x8x1xf32>
    %11 = vector.extract_strided_slice %4 {offsets = [0, 0, 33], sizes = [2, 8, 1], strides = [1, 1, 1]} : vector<2x8x34xf32> to vector<2x8x1xf32>
    %c0_9 = arith.constant 0 : index
    %c0_10 = arith.constant 0 : index
    %12 = memref.load %arg4[%c0_9, %c0_10] : memref<1x1xf32, #tpu.memory_space<smem>>
    %13 = vector.broadcast %12 : f32 to vector<2x8x1xf32>
    %14 = arith.addf %11, %13 : vector<2x8x1xf32>
    %c0_11 = arith.constant 0 : index
    %c0_12 = arith.constant 0 : index
    %c0_13 = arith.constant 0 : index
    %15 = vector.load %arg6[%c0_11, %c0_12, %c0_13] : memref<2x8x1xf32, #tpu.memory_space<vmem>>, vector<2x8x1xf32>
    tpu.vector_store %arg6[%c0_11, %c0_12, %c0_13], %10 {strides = array<i32>} : memref<2x8x1xf32, #tpu.memory_space<vmem>>, vector<2x8x1xf32>,
    %16 = vector.shape_cast %14 : vector<2x8x1xf32> to vector<2x1x8xf32>
    %c0_14 = arith.constant 0 : index
    %c0_15 = arith.constant 0 : index
    %c0_16 = arith.constant 0 : index
    %17 = vector.load %arg7[%c0_14, %c0_15, %c0_16] : memref<2x1x8xf32, #tpu.memory_space<vmem>>, vector<2x1x8xf32>
    tpu.vector_store %arg7[%c0_14, %c0_15, %c0_16], %16 {strides = array<i32>} : memref<2x1x8xf32, #tpu.memory_space<vmem>>, vector<2x1x8xf32>,
    return
  }
  func.func @transform_0(%arg0: i32) -> (i32, i32, i32) {
    %c0_i32 = arith.constant 0 : i32
    %c0_i32_0 = arith.constant 0 : i32
    %c0_i32_1 = arith.constant 0 : i32
    return %c0_i32, %arg0, %c0_i32_0 : i32, i32, i32
  }
  func.func @transform_1(%arg0: i32) -> (i32, i32) {
    %c0_i32 = arith.constant 0 : i32
    %c0_i32_0 = arith.constant 0 : i32
    %c0_i32_1 = arith.constant 0 : i32
    return %c0_i32, %c0_i32_0 : i32, i32
  }
  func.func @transform_2(%arg0: i32) -> (i32, i32) {
    %c0_i32 = arith.constant 0 : i32
    %c0_i32_0 = arith.constant 0 : i32
    %c0_i32_1 = arith.constant 0 : i32
    return %c0_i32, %c0_i32_0 : i32, i32
  }
  func.func @transform_3(%arg0: i32) -> (i32, i32) {
    %c0_i32 = arith.constant 0 : i32
    %c0_i32_0 = arith.constant 0 : i32
    %c0_i32_1 = arith.constant 0 : i32
    return %c0_i32, %c0_i32_0 : i32, i32
  }
  func.func @transform_4(%arg0: i32) -> (i32, i32, i32) {
    %c0_i32 = arith.constant 0 : i32
    %c0_i32_0 = arith.constant 0 : i32
    %c0_i32_1 = arith.constant 0 : i32
    return %c0_i32, %arg0, %c0_i32_0 : i32, i32, i32
  }
  func.func @transform_5(%arg0: i32) -> (i32, i32, i32) {
    %c0_i32 = arith.constant 0 : i32
    %c0_i32_0 = arith.constant 0 : i32
    %c0_i32_1 = arith.constant 0 : i32
    return %c0_i32, %arg0, %c0_i32_0 : i32, i32, i32
  }
  func.func @transform_6(%arg0: i32) -> (i32, i32, i32) {
    %c0_i32 = arith.constant 0 : i32
    %c0_i32_0 = arith.constant 0 : i32
    %c0_i32_1 = arith.constant 0 : i32
    return %c0_i32, %c0_i32_0, %arg0 : i32, i32, i32
  }
}

module attributes {stable_mosaic.version = 11 : i64} {
  func.func @attn_kernel(%arg0: i32, %arg1: memref<2x8x32xf32, #tpu.memory_space<vmem>>, %arg2: memref<2x1x8xf32, #tpu.memory_space<vmem>>, %arg3: memref<2x8x1xf32, #tpu.memory_space<vmem>>, %arg4: memref<1x1xf32, #tpu.memory_space<smem>>, %arg5: memref<2x8x32xf32, #tpu.memory_space<vmem>>) attributes {dimension_semantics = [#tpu.dimension_semantics<parallel>], iteration_bounds = array<i64: 1>, scalar_prefetch = 0 : i64, scratch_operands = 0 : i64, tpu.core_type = #tpu.core_type<tc>, window_params = [{pipeline_mode = #tpu.pipeline_mode<synchronous>, transform_indices = @transform_0, window_bounds = array<i64: 2, 8, 32>}, {pipeline_mode = #tpu.pipeline_mode<synchronous>, transform_indices = @transform_1, window_bounds = array<i64: 2, 1, 8>}, {transform_indices = @transform_2, window_bounds = array<i64: 2, 8, 1>}, {transform_indices = @transform_3, window_bounds = array<i64: 1, 1>}, {transform_indices = @transform_4, window_bounds = array<i64: 2, 8, 32>}]} {
    %c0 = arith.constant 0 : index
    %c0_0 = arith.constant 0 : index
    %c0_1 = arith.constant 0 : index
    %0 = vector.load %arg3[%c0, %c0_0, %c0_1] : memref<2x8x1xf32, #tpu.memory_space<vmem>>, vector<2x8x1xf32>
    %c0_2 = arith.constant 0 : index
    %c0_3 = arith.constant 0 : index
    %c0_4 = arith.constant 0 : index
    %1 = vector.load %arg2[%c0_2, %c0_3, %c0_4] : memref<2x1x8xf32, #tpu.memory_space<vmem>>, vector<2x1x8xf32>
    %2 = vector.broadcast %0 : vector<2x8x1xf32> to vector<2x8x8xf32>
    %3 = vector.broadcast %1 : vector<2x1x8xf32> to vector<2x8x8xf32>
    %4 = arith.addf %2, %3 : vector<2x8x8xf32>
    %cst = arith.constant 0.000000e+00 : f32
    %5 = vector.broadcast %cst : f32 to vector<2x8x8xf32>
    %6 = arith.cmpf oge, %4, %5 : vector<2x8x8xf32>
    %cst_5 = arith.constant 0.00999999977 : f32
    %7 = vector.broadcast %cst_5 : f32 to vector<2x8x8xf32>
    %8 = arith.mulf %7, %4 : vector<2x8x8xf32>
    %9 = arith.select %6, %4, %8 : vector<2x8x8xi1>, vector<2x8x8xf32>
    %cst_6 = arith.constant dense<0xFF800000> : vector<8x8xf32>
    %10 = vector.multi_reduction <maximumf>, %9, %cst_6 [0] : vector<2x8x8xf32> to vector<8x8xf32>
    %11 = vector.shape_cast %10 : vector<8x8xf32> to vector<1x8x8xf32>
    %12 = vector.broadcast %11 : vector<1x8x8xf32> to vector<2x8x8xf32>
    %13 = arith.subf %9, %12 : vector<2x8x8xf32>
    %14 = math.exp %13 : vector<2x8x8xf32>
    %cst_7 = arith.constant dense<0.000000e+00> : vector<8x8xf32>
    %15 = vector.multi_reduction <add>, %14, %cst_7 [0] : vector<2x8x8xf32> to vector<8x8xf32>
    %16 = vector.shape_cast %15 : vector<8x8xf32> to vector<1x8x8xf32>
    %17 = tpu.reciprocal %16 {approx = true} : vector<1x8x8xf32> -> vector<1x8x8xf32>
    %18 = arith.mulf %16, %17 : vector<1x8x8xf32>
    %cst_8 = arith.constant 2.000000e+00 : f32
    %19 = vector.broadcast %cst_8 : f32 to vector<1x8x8xf32>
    %20 = arith.subf %19, %18 : vector<1x8x8xf32>
    %21 = arith.mulf %17, %20 : vector<1x8x8xf32>
    %22 = arith.mulf %16, %21 : vector<1x8x8xf32>
    %cst_9 = arith.constant 2.000000e+00 : f32
    %23 = vector.broadcast %cst_9 : f32 to vector<1x8x8xf32>
    %24 = arith.subf %23, %22 : vector<1x8x8xf32>
    %25 = arith.mulf %21, %24 : vector<1x8x8xf32>
    %26 = vector.broadcast %25 : vector<1x8x8xf32> to vector<2x8x8xf32>
    %27 = arith.mulf %14, %26 : vector<2x8x8xf32>
    %c0_10 = arith.constant 0 : index
    %c0_11 = arith.constant 0 : index
    %c0_12 = arith.constant 0 : index
    %28 = vector.load %arg1[%c0_10, %c0_11, %c0_12] : memref<2x8x32xf32, #tpu.memory_space<vmem>>, vector<2x8x32xf32>
    "tpu.trace_start"() <{level = 10 : i32, message = "bij,bjd->bid"}> : () -> ()
    %cst_13 = arith.constant dense<0.000000e+00> : vector<2x8x32xf32>
    %29 = tpu.matmul %27, %28, %cst_13 {dimension_numbers = #tpu.dot_dimension_numbers<[2], [1], [1], [2], [0, 0, 0, 1, 1, 2], [0], [0]>} : vector<2x8x8xf32>, vector<2x8x32xf32>, vector<2x8x32xf32> -> vector<2x8x32xf32>
    "tpu.trace_stop"() : () -> ()
    %c0_14 = arith.constant 0 : index
    %c0_15 = arith.constant 0 : index
    %30 = memref.load %arg4[%c0_14, %c0_15] : memref<1x1xf32, #tpu.memory_space<smem>>
    %31 = vector.broadcast %30 : f32 to vector<2x8x32xf32>
    %32 = arith.addf %29, %31 : vector<2x8x32xf32>
    %cst_16 = arith.constant 0.000000e+00 : f32
    %33 = vector.broadcast %cst_16 : f32 to vector<2x8x32xf32>
    %34 = arith.maximumf %32, %33 : vector<2x8x32xf32>
    %c0_17 = arith.constant 0 : index
    %c0_18 = arith.constant 0 : index
    %c0_19 = arith.constant 0 : index
    %35 = vector.load %arg5[%c0_17, %c0_18, %c0_19] : memref<2x8x32xf32, #tpu.memory_space<vmem>>, vector<2x8x32xf32>
    tpu.vector_store %arg5[%c0_17, %c0_18, %c0_19], %34 {strides = array<i32>} : memref<2x8x32xf32, #tpu.memory_space<vmem>>, vector<2x8x32xf32>,
    return
  }
  func.func @transform_0(%arg0: i32) -> (i32, i32, i32) {
    %c0_i32 = arith.constant 0 : i32
    %c0_i32_0 = arith.constant 0 : i32
    %c0_i32_1 = arith.constant 0 : i32
    %c0_i32_2 = arith.constant 0 : i32
    return %c0_i32, %c0_i32_0, %c0_i32_1 : i32, i32, i32
  }
  func.func @transform_1(%arg0: i32) -> (i32, i32, i32) {
    %c0_i32 = arith.constant 0 : i32
    %c0_i32_0 = arith.constant 0 : i32
    %c0_i32_1 = arith.constant 0 : i32
    %c0_i32_2 = arith.constant 0 : i32
    return %c0_i32, %c0_i32_0, %c0_i32_1 : i32, i32, i32
  }
  func.func @transform_2(%arg0: i32) -> (i32, i32, i32) {
    %c0_i32 = arith.constant 0 : i32
    %c0_i32_0 = arith.constant 0 : i32
    %c0_i32_1 = arith.constant 0 : i32
    return %c0_i32, %arg0, %c0_i32_0 : i32, i32, i32
  }
  func.func @transform_3(%arg0: i32) -> (i32, i32) {
    %c0_i32 = arith.constant 0 : i32
    %c0_i32_0 = arith.constant 0 : i32
    %c0_i32_1 = arith.constant 0 : i32
    return %c0_i32, %c0_i32_0 : i32, i32
  }
  func.func @transform_4(%arg0: i32) -> (i32, i32, i32) {
    %c0_i32 = arith.constant 0 : i32
    %c0_i32_0 = arith.constant 0 : i32
    %c0_i32_1 = arith.constant 0 : i32
    return %c0_i32, %arg0, %c0_i32_0 : i32, i32, i32
  }
}

</mosaic_0001>

<bundles_post_ra>
// kernel: attn_head.2
= control target key start
LH: loop header
LB: loop body
LE: loop exit
PB: predicated region body
PF: predicated region fallthrough
CT: control target
= control target key end

     0   :  { %vm28_vm0 = vcmask 261120   ;;  %v117_v6 = vmov 33   ;;  %v87_v15 = vlaneseq  ;;  %vm76_vm1 = vcmask 7168   ;;  %s200_s1 = inlined_call_operand.vmem [shape: f32[32,34], index: 1, kind: input, shape index: {}]   ;;  %s201_s0 = inlined_call_operand.vmem [shape: f32[2,8,32], index: 0, kind: input, shape index: {}]   ;;  %s202_s3 = inlined_call_operand.<no memory space> [shape: f32[1,1], index: 3, kind: input, shape index: {}]   ;;  %s203_s2 = inlined_call_operand.<no memory space> [shape: f32[1,1], index: 2, kind: input, shape index: {}]   ;;  %s204_s4 = inlined_call_operand.vmem [shape: f32[2,8,32], index: 4, kind: output, shape index: {0}]   ;;  %s205_s5 = inlined_call_operand.vmem [shape: f32[2,8,1], index: 5, kind: output, shape index: {1}]   ;;  %s206_s6 = inlined_call_operand.vmem [shape: f32[2,1,8], index: 6, kind: output, shape index: {2}]  }
   0x1   :  { %v27_v0 = vld [vmem:[%s200_s1 + $0x18] sm:$0xff]  ;;  %v26_v1 = vld [vmem:[%s200_s1 + $0x10] sm:$0xff]  ;;  %v25_v2 = vld [vmem:[%s200_s1 + $0x8] sm:$0xff]  ;;  %116 = vset.pattern.permute.xlu0 %v117_v6  ;;  %v65_v7 = vstv %s202_s3  ;;  %s118_s3 = smov 96   ;;  %vm93_vm2 = vcmask 57344  }
   0x2   :  { %47 = vmatpush.msra.mxu0 %v27_v0  ;;  %110 = vmatpush.msra.mxu1 %v27_v0  ;;  %v24_v3 = vld [vmem:[%s200_s1] sm:$0xff]  ;;  %v23_v5 = vld [vmem:[%s201_s0 + $0x8] sm:$0xff]  ;;  %v61_v8 = vstv %s203_s2  ;;  %v88_v16 = vand.u32 127, %v87_v15 }
   0x3   :  { %v22_v4 = vld [vmem:[%s201_s0] sm:$0xff] }
   0x4   :  { %48 = vmatpush.msra.mxu0 %v26_v1  ;;  %111 = vmatpush.msra.mxu1 %v26_v1 }
   0x6   :  { %49 = vmatpush.msra.mxu0 %v25_v2  ;;  %112 = vmatpush.msra.mxu1 %v25_v2 }
   0x8   :  { %50 = vmatpush.msra.mxu0 %v24_v3  ;;  %113 = vmatpush.msra.mxu1 %v24_v3 }
   0x9   :  { %108 = vmatmul.msk.f32.vlgmr.msra.gmra.mxu0 %vm28_vm0, %v22_v4  ;;  %109 = vmatmul.msk.f32.vlgmr.msra.gmra.mxu1 %vm28_vm0, %v23_v5 }
  0x86   :  { %v52_v9 = vpop.f32.mrf.mxu0  ;;  %v55_v10 = vpop.f32.mrf.mxu1 }
  0x87   :  { %58 = vst.msk [vmem:[%s204_s4] sm:$0xff] %vm28_vm0, %v52_v9  ;;  %v66_v11 = vadd.f32 %v65_v7, %v52_v9  ;;  %v62_v12 = vadd.f32 %v61_v8, %v52_v9  ;;  %v63_v13 = vadd.f32 %v61_v8, %v55_v10  ;;  %v67_v14 = vadd.f32 %v65_v7, %v55_v10 }
  0x88   :  { %59 = vst.msk [vmem:[%s204_s4 + $0x8] sm:$0xff] %vm28_vm0, %v55_v10 }
  0x89   :  { %82 = vperm.xlu0 %116, %v66_v11   ;;  %70 = vrot.lane.b32.xlu1 %v62_v12, %s118_s3 }
  0x91   :  { %85 = vperm.xlu0 %116, %v67_v14   ;;  %72 = vrot.lane.b32.xlu1 %v63_v13, %s118_s3 }
  0xfb   :  { %v83_v17 = vpop.permute.xlu0 %82  ;;  %v71_v18 = vpop.permute.xlu1 %70 }
  0xfc   :  { %v89_v19 = vperm.slane %v83_v17, %v88_v16  ;;  %77 = vst.msk [vmem:[%s205_s5] sm:$0xff] %vm76_vm1, %v71_v18 }
  0xfe   :  { %94 = vst.msk [vmem:[%s206_s6] sm:$0x1] %vm93_vm2, %v89_v19 }
 0x103   :  { %v86_v20 = vpop.permute.xlu0 %85  ;;  %v73_v21 = vpop.permute.xlu1 %72 }
 0x104   :  { %v90_v22 = vperm.slane %v86_v20, %v88_v16  ;;  %78 = vst.msk [vmem:[%s205_s5 + $0x8] sm:$0xff] %vm76_vm1, %v73_v21 }
 0x106   :  { %95 = vst.msk [vmem:[%s206_s6 + $0x1] sm:$0x1] %vm93_vm2, %v90_v22 }

// kernel: attn_head.3
= control target key start
LH: loop header
LB: loop body
LE: loop exit
PB: predicated region body
PF: predicated region fallthrough
CT: control target
= control target key end

     0   :  { %v183_v1 = vmov 0   ;;  %s242_s0 = inlined_call_operand.vmem [shape: f32[2,8,32], index: 0, kind: input, shape index: {}]   ;;  %s243_s1 = inlined_call_operand.vmem [shape: f32[2,1,8], index: 1, kind: input, shape index: {}]   ;;  %s244_s2 = inlined_call_operand.vmem [shape: f32[2,8,1], index: 2, kind: input, shape index: {}]   ;;  %s245_s3 = inlined_call_operand.<no memory space> [shape: f32[1,1], index: 3, kind: input, shape index: {}]   ;;  %s246_s4 = inlined_call_operand.hbm [shape: f32[2,8,32], index: 4, kind: output, shape index: {}]  }
   0x1   :  { %v19_v0 = vld [vmem:[%s244_s2] sm:$0xff]  ;;  %148 = vset.pattern.permute.xlu0 %v183_v1 }
   0x2   :  { %10 = vsyncpa [#allocation4], 0  ;;  %25 = vperm.xlu0 %148, %v19_v0   ;;  %v20_v2 = vld [vmem:[%s244_s2 + $0x8] sm:$0xff]  ;;  %v69_v3 = vld [vmem:[%s242_s0] sm:$0xff]  ;;  %vm47_vm1 = vcmask 64512   ;;  %v72_v36 = vstv %s245_s3  ;;  %s184_s2 = smov [#allocation3]  }
   0x3   :  { %v70_v4 = vld [vmem:[%s242_s0 + $0x8] sm:$0xff]  ;;  %91 = vmatpush.msra.mxu0 %v69_v3  ;;  %v149_v5 = vld [vmem:[%s243_s1] ss:$0 sm:$0xff]  ;;  %v150_v8 = vld [vmem:[%s243_s1 + $0x1] ss:$0 sm:$0xff]  ;;  %s128_s27 = sshll.u32 %s184_s2, 4  ;;  %s129_s27 = int_to_ptr.vmem [resolvable:$true] %s128_s27 }
   0x4   :  { %114 = vmatpush.msra.mxu1 %v70_v4  ;;  %s130_s30 = sshll.u32 %s246_s4, 4  ;;  %vm121_vm3 = vcmask 261120   ;;  %s185_s5 = smov 128   ;;  %s131_s30 = int_to_ptr.hbm [resolvable:$true] %s130_s30 }
   0x5   :  { %s186_s6 = smov 8  }
   0xa   :  { %30 = vperm.xlu0 %148, %v20_v2  }
  0x74   :  { %v26_v6 = vpop.permute.xlu0 %25 }
  0x75   :  { %v39_v7 = vadd.f32 %v149_v5, %v26_v6 }
  0x77   :  { %v43_v9 = vmul.f32 0.01, %v39_v7  ;;  %vm41_vm0 = vcmp.ge.f32.partialorder %v39_v7, 0.0 }
  0x79   :  { %v45_v12 = vsel %vm41_vm0, %v39_v7, %v43_v9 }
  0x7a   :  { %v48_v15 = vsel %vm47_vm1, %v45_v12, -inf }
  0x7c   :  { %v31_v10 = vpop.permute.xlu0 %30 }
  0x7d   :  { %v40_v11 = vadd.f32 %v150_v8, %v31_v10 }
  0x7f   :  { %vm42_vm2 = vcmp.ge.f32.partialorder %v40_v11, 0.0  ;;  %v44_v13 = vmul.f32 0.01, %v40_v11 }
  0x81   :  { %v46_v14 = vsel %vm42_vm2, %v40_v11, %v44_v13 }
  0x82   :  { %v49_v16 = vsel %vm47_vm1, %v46_v14, -inf }
  0x83   :  { %v50_v17 = vmax.f32 %v48_v15, %v49_v16 }
  0x85   :  { %v51_v18 = vsub.f32 %v45_v12, %v50_v17  ;;  %v52_v19 = vsub.f32 %v46_v14, %v50_v17 }
  0x87   :  { %v53_v20 = vmul.f32 1.442695, %v51_v18  ;;  %v55_v21 = vmul.f32 1.442695, %v52_v19 }
  0x89   :  { %151 = vpow2.f32 %v53_v20 }
  0x8a   :  { %153 = vpow2.f32 %v55_v21 }
  0x8f   :  { %v152_v22 = vpop.eup %151 }
  0x90   :  { %v154_v23 = vpop.eup %153  ;;  %v57_v24 = vsel %vm47_vm1, %v152_v22, 0.0 }
  0x91   :  { %v58_v25 = vsel %vm47_vm1, %v154_v23, 0.0 }
  0x92   :  { %v59_v26 = vadd.f32 %v58_v25, %v57_v24 }
  0x94   :  { %155 = vrcp.f32 %v59_v26 }
  0x9a   :  { %v156_v27 = vpop.eup %155 }
  0x9b   :  { %v61_v28 = vmul.f32 %v156_v27, %v59_v26 }
  0x9d   :  { %v62_v29 = vsub.f32 2.0, %v61_v28 }
  0x9f   :  { %v63_v30 = vmul.f32 %v156_v27, %v62_v29 }
  0xa1   :  { %v64_v31 = vmul.f32 %v63_v30, %v59_v26 }
  0xa3   :  { %v65_v32 = vsub.f32 2.0, %v64_v31 }
  0xa5   :  { %v66_v33 = vmul.f32 %v65_v32, %v63_v30 }
  0xa7   :  { %v67_v34 = vmul.f32 %v152_v22, %v66_v33  ;;  %v68_v35 = vmul.f32 %v154_v23, %v66_v33 }
  0xa9   :  { %142 = vmatmul.msk.f32.vlgmr.msra.gmra.mxu0 %vm47_vm1, %v67_v34  ;;  %143 = vmatmul.msk.f32.vlgmr.msra.gmra.mxu1 %vm47_vm1, %v68_v35 }
 0x126   :  { %v93_v37 = vpop.f32.mrf.mxu0  ;;  %v116_v38 = vpop.f32.mrf.mxu1 }
 0x127   :  { %v94_v39 = vadd.f32 %v93_v37, %v72_v36  ;;  %v117_v40 = vadd.f32 %v116_v38, %v72_v36 }
 0x129   :  { %v119_v41 = vmax.f32 %v94_v39, 0.0  ;;  %v120_v42 = vmax.f32 %v117_v40, 0.0 }
 0x12b   :  { %122 = vst.msk [vmem:[#allocation3] sm:$0xff] %vm121_vm3, %v119_v41 }
 0x12c   :  { %123 = vst.msk [vmem:[#allocation3 + $0x8] sm:$0xff] %vm121_vm3, %v120_v42 }
 0x12d   :  { %136 = dma.vmem_to_hbm [thread:$0]  %s129_s27, 256, %s131_s30, [#allocation4], %s185_s5, %s185_s5, %s186_s6  }
 0x12e   :  { %181 = dma.done.wait [#allocation4], 256  }
 0x12f   :  { %182 = vsyncadd [#allocation4], 4294967040 }
 0x130   :  { %141 = vsyncpa [#allocation4], 1 }

</bundles_post_ra>
